<compile_context>
chip_gen: v7x
topology: tpu7x:2x2x1
jax: 0.10.0
libtpu: 0.0.40
codegen_flags: <defaults>
</compile_context>

<pallas_src>
import jax
import jax.numpy as jnp
from jax.experimental import pallas as pl
from jax.experimental.pallas import tpu as pltpu

SUBLANE = 8                 # f32 sublane alignment (second-to-last dim)
MAX_TILE_B = 4096           # rows per grid step
VMEM_BUDGET = 40 << 20      # conservative resident-VMEM budget (v7x = 64 MiB physical)


def _round_up(n, m):
    return (n + m - 1) // m * m


def _choose_tile_b(batch):
    """Batch tile: multiple of 8, <= MAX_TILE_B, >= 2 grid steps when possible
    (v7x megacore), mostly-full tail tile (bounded padding waste)."""
    if batch <= SUBLANE:
        return _round_up(max(batch, 1), SUBLANE)
    n_tiles = max(2, pl.cdiv(batch, MAX_TILE_B))
    return _round_up(pl.cdiv(batch, n_tiles), SUBLANE)


# ---------------------------------------------------------------------------
# Fused kernel: applies the whole module chain on in-VMEM values.
# ---------------------------------------------------------------------------

def _make_fused_kernel(layer_kinds):
    """layer_kinds: tuple of 'linear' / 'relu' describing the module order."""

    def kernel(x_ref, *refs):
        o_ref = refs[-1]
        param_refs = refs[:-1]            # interleaved (w_ref, b_ref) per Linear
        h = x_ref[...]                    # (tile_b, d_in) f32
        pi = 0
        for kind in layer_kinds:
            if kind == "linear":
                w_ref = param_refs[pi]
                b_ref = param_refs[pi + 1]
                pi += 2
                # (tile_b, Din) @ (Din, Dout) on the MXU; true f32 accumulation.
                h = jnp.dot(h, w_ref[...],
                            preferred_element_type=jnp.float32,
                            precision=jax.lax.Precision.HIGHEST)
                h = h + b_ref[...]        # VPU epilogue, hidden under MXU
            else:                         # relu
                h = jnp.maximum(h, 0.0)
        o_ref[...] = h.astype(o_ref.dtype)

    return kernel


# ---------------------------------------------------------------------------
# Modules
# ---------------------------------------------------------------------------

class Linear:
    def __init__(self, key, in_features, out_features, dtype=jnp.float32):
        kw, kb = jax.random.split(key)
        bound = 1.0 / (in_features ** 0.5)
        # PyTorch nn.Linear default init, stored PyTorch-style (out, in).
        self.weight = jax.random.uniform(
            kw, (out_features, in_features), dtype, minval=-bound, maxval=bound)
        self.bias = jax.random.uniform(
            kb, (out_features,), dtype, minval=-bound, maxval=bound)

        self.in_features = in_features
        self.out_features = out_features

        # Pre-transposed kernel copies (built once; no per-call transpose,
        # no HBM-side padding).
        self.w_t = jnp.asarray(self.weight.T)              # (in, out)
        self.b_row = jnp.asarray(self.bias).reshape(1, out_features)


class ReLU:
    pass  # elementwise; handled inside the fused kernel


class Sequential:
    """Applies each module in order (PyTorch Sequential.forward semantics),
    fused into one Pallas TPU kernel."""

    def __init__(self, *args):
        self._modules = list(args)
        self._fused = jax.jit(self._build_forward())

    def __iter__(self):
        return iter(self._modules)

    # -- fused forward ------------------------------------------------------

    def _build_forward(self):
        kinds = []
        for m in self._modules:
            if isinstance(m, Linear):
                kinds.append("linear")
            elif isinstance(m, ReLU):
                kinds.append("relu")
            else:
                raise NotImplementedError(type(m))
        kinds = tuple(kinds)

        linears = [m for m in self._modules if isinstance(m, Linear)]
        d_in = linears[0].in_features
        d_out = linears[-1].out_features
        flops_per_row = 2 * sum(l.in_features * l.out_features for l in linears)

        kernel = _make_fused_kernel(kinds)

        def forward(x, *params):
            batch = x.shape[0]
            itemsize = jnp.dtype(x.dtype).itemsize
            weight_bytes = sum(int(p.size) * jnp.dtype(p.dtype).itemsize
                               for p in params)

            tile_b = _choose_tile_b(batch)

            # VMEM budget: weights fully resident (double-buffered by the
            # pipeline) + double-buffered in/out activation tiles.
            def vmem_est(tb):
                return 2 * weight_bytes + 2 * tb * (d_in + d_out) * itemsize

            while vmem_est(tile_b) > VMEM_BUDGET and tile_b > SUBLANE:
                tile_b = max(SUBLANE, _round_up(tile_b // 2, SUBLANE))
            if vmem_est(tile_b) > VMEM_BUDGET:
                # TODO(synk): tile over out-features / contraction when a single
                # Linear's weights alone exceed the v7x resident-VMEM budget.
                raise ValueError("Linear weights too large for resident-weight kernel")

            grid = (pl.cdiv(batch, tile_b),)   # partial tail block, no batch pad

            # Activations: true feature widths (block last dim == full array dim,
            # so the (8,128) rule does not apply and the DMA is contiguous).
            in_specs = [pl.BlockSpec((tile_b, d_in), lambda i: (i, 0))]
            for p in params:
                # Weights / biases: full array resident in VMEM for every tile.
                in_specs.append(pl.BlockSpec(p.shape, lambda i: (0, 0)))

            cost = pl.CostEstimate(
                flops=batch * flops_per_row,
                transcendentals=0,
                bytes_accessed=batch * (d_in + d_out) * itemsize + weight_bytes,
            )

            return pl.pallas_call(
                kernel,
                out_shape=jax.ShapeDtypeStruct((batch, d_out), x.dtype),
                grid=grid,
                in_specs=in_specs,
                out_specs=pl.BlockSpec((tile_b, d_out), lambda i: (i, 0)),
                compiler_params=pltpu.CompilerParams(
                    dimension_semantics=("parallel",),
                    vmem_limit_bytes=int(min(48 << 20,
                                             max(32 << 20, 2 * vmem_est(tile_b)))),
                ),
                cost_estimate=cost,
            )(x, *params)

        return forward

    def __call__(self, inputs):
        params = []
        for m in self._modules:
            if isinstance(m, Linear):
                params.append(m.w_t)
                params.append(m.b_row)
        return self._fused(inputs, *params)

    # TODO(synk): compile/fit/evaluate/predict/save/load are training & I/O
    # utilities (optimizer loop, torch.save, ...) with no Pallas-kernel
    # equivalent; only forward() is implemented here.


# ---------------------------------------------------------------------------
# Demo
# ---------------------------------------------------------------------------

if __name__ == "__main__":
    key = jax.random.PRNGKey(0)
    k_x, k_l1, k_l2 = jax.random.split(key, 3)

    batch, d_in, d_hidden, d_out = 32, 32, 64, 16
    x = jax.random.normal(k_x, (batch, d_in), jnp.float32)

    model = Sequential(
        Linear(k_l1, d_in, d_hidden),
        ReLU(),
        Linear(k_l2, d_hidden, d_out),
    )

    y = model(x)
    jax.block_until_ready(y)

    # Reference check in plain JAX (same math, PyTorch-layout params, f32).
    ref = x
    for m in model:
        if isinstance(m, Linear):
            ref = jnp.dot(ref, m.weight.T,
                          precision=jax.lax.Precision.HIGHEST) + m.bias
        else:
            ref = jnp.maximum(ref, 0.0)

    assert y.shape == (batch, d_out), y.shape
    assert jnp.allclose(y, ref, atol=1e-5, rtol=1e-5), (
        float(jnp.max(jnp.abs(y - ref))))

    print("KERNEL_OK")
</pallas_src>

<mosaic_0001>
module attributes {stable_mosaic.version = 11 : i64} {
  func.func @kernel(%arg0: i32, %arg1: memref<16x32xf32, #tpu.memory_space<vmem>>, %arg2: memref<32x64xf32, #tpu.memory_space<vmem>>, %arg3: memref<1x64xf32, #tpu.memory_space<vmem>>, %arg4: memref<64x16xf32, #tpu.memory_space<vmem>>, %arg5: memref<1x16xf32, #tpu.memory_space<vmem>>, %arg6: memref<16x16xf32, #tpu.memory_space<vmem>>) attributes {dimension_semantics = [#tpu.dimension_semantics<parallel>], iteration_bounds = array<i64: 2>, scalar_prefetch = 0 : i64, scratch_operands = 0 : i64, tpu.core_type = #tpu.core_type<tc>, window_params = [{transform_indices = @transform_0, window_bounds = array<i64: 16, 32>}, {pipeline_mode = #tpu.pipeline_mode<synchronous>, transform_indices = @transform_1, window_bounds = array<i64: 32, 64>}, {pipeline_mode = #tpu.pipeline_mode<synchronous>, transform_indices = @transform_2, window_bounds = array<i64: 1, 64>}, {pipeline_mode = #tpu.pipeline_mode<synchronous>, transform_indices = @transform_3, window_bounds = array<i64: 64, 16>}, {pipeline_mode = #tpu.pipeline_mode<synchronous>, transform_indices = @transform_4, window_bounds = array<i64: 1, 16>}, {transform_indices = @transform_5, window_bounds = array<i64: 16, 16>}]} {
    %c0 = arith.constant 0 : index
    %c0_0 = arith.constant 0 : index
    %0 = vector.load %arg1[%c0, %c0_0] : memref<16x32xf32, #tpu.memory_space<vmem>>, vector<16x32xf32>
    %c0_1 = arith.constant 0 : index
    %c0_2 = arith.constant 0 : index
    %1 = vector.load %arg2[%c0_1, %c0_2] : memref<32x64xf32, #tpu.memory_space<vmem>>, vector<32x64xf32>
    %cst = arith.constant dense<0.000000e+00> : vector<16x64xf32>
    %2 = tpu.matmul %0, %1, %cst {dimension_numbers = #tpu.dot_dimension_numbers<[1], [0], [0], [1], [0, 0, 1, 1], [], []>, precision = #tpu.contract_precision<fp32>} : vector<16x32xf32>, vector<32x64xf32>, vector<16x64xf32> -> vector<16x64xf32>
    %c0_3 = arith.constant 0 : index
    %c0_4 = arith.constant 0 : index
    %3 = vector.load %arg3[%c0_3, %c0_4] : memref<1x64xf32, #tpu.memory_space<vmem>>, vector<1x64xf32>
    %4 = vector.broadcast %3 : vector<1x64xf32> to vector<16x64xf32>
    %5 = arith.addf %2, %4 : vector<16x64xf32>
    %cst_5 = arith.constant 0.000000e+00 : f32
    %6 = vector.broadcast %cst_5 : f32 to vector<16x64xf32>
    %7 = arith.maximumf %5, %6 : vector<16x64xf32>
    %c0_6 = arith.constant 0 : index
    %c0_7 = arith.constant 0 : index
    %8 = vector.load %arg4[%c0_6, %c0_7] : memref<64x16xf32, #tpu.memory_space<vmem>>, vector<64x16xf32>
    %cst_8 = arith.constant dense<0.000000e+00> : vector<16x16xf32>
    %9 = tpu.matmul %7, %8, %cst_8 {dimension_numbers = #tpu.dot_dimension_numbers<[1], [0], [0], [1], [0, 0, 1, 1], [], []>, precision = #tpu.contract_precision<fp32>} : vector<16x64xf32>, vector<64x16xf32>, vector<16x16xf32> -> vector<16x16xf32>
    %c0_9 = arith.constant 0 : index
    %c0_10 = arith.constant 0 : index
    %10 = vector.load %arg5[%c0_9, %c0_10] : memref<1x16xf32, #tpu.memory_space<vmem>>, vector<1x16xf32>
    %11 = vector.broadcast %10 : vector<1x16xf32> to vector<16x16xf32>
    %12 = arith.addf %9, %11 : vector<16x16xf32>
    %c0_11 = arith.constant 0 : index
    %c0_12 = arith.constant 0 : index
    %13 = vector.load %arg6[%c0_11, %c0_12] : memref<16x16xf32, #tpu.memory_space<vmem>>, vector<16x16xf32>
    tpu.vector_store %arg6[%c0_11, %c0_12], %12 {strides = array<i32>} : memref<16x16xf32, #tpu.memory_space<vmem>>, vector<16x16xf32>,
    return
  }
  func.func @transform_0(%arg0: i32) -> (i32, i32) {
    %c0_i32 = arith.constant 0 : i32
    %c0_i32_0 = arith.constant 0 : i32
    return %arg0, %c0_i32 : i32, i32
  }
  func.func @transform_1(%arg0: i32) -> (i32, i32) {
    %c0_i32 = arith.constant 0 : i32
    %c0_i32_0 = arith.constant 0 : i32
    %c0_i32_1 = arith.constant 0 : i32
    return %c0_i32, %c0_i32_0 : i32, i32
  }
  func.func @transform_2(%arg0: i32) -> (i32, i32) {
    %c0_i32 = arith.constant 0 : i32
    %c0_i32_0 = arith.constant 0 : i32
    %c0_i32_1 = arith.constant 0 : i32
    return %c0_i32, %c0_i32_0 : i32, i32
  }
  func.func @transform_3(%arg0: i32) -> (i32, i32) {
    %c0_i32 = arith.constant 0 : i32
    %c0_i32_0 = arith.constant 0 : i32
    %c0_i32_1 = arith.constant 0 : i32
    return %c0_i32, %c0_i32_0 : i32, i32
  }
  func.func @transform_4(%arg0: i32) -> (i32, i32) {
    %c0_i32 = arith.constant 0 : i32
    %c0_i32_0 = arith.constant 0 : i32
    %c0_i32_1 = arith.constant 0 : i32
    return %c0_i32, %c0_i32_0 : i32, i32
  }
  func.func @transform_5(%arg0: i32) -> (i32, i32) {
    %c0_i32 = arith.constant 0 : i32
    %c0_i32_0 = arith.constant 0 : i32
    return %arg0, %c0_i32 : i32, i32
  }
}

</mosaic_0001>

<bundles_post_ra>
// kernel: forward.1
= control target key start
LH: loop header
LB: loop body
LE: loop exit
PB: predicated region body
PF: predicated region fallthrough
CT: control target
= control target key end

     0   :  { %s1942_s18 = smov 0   ;;  %s2172_s0 = inlined_call_operand.vmem [shape: f32[32,32], index: 0, kind: input, shape index: {}]   ;;  %s2173_s1 = inlined_call_operand.vmem [shape: f32[32,64], index: 1, kind: input, shape index: {}]   ;;  %s2174_s2 = inlined_call_operand.vmem [shape: f32[1,64], index: 2, kind: input, shape index: {}]   ;;  %s2175_s3 = inlined_call_operand.vmem [shape: f32[64,16], index: 3, kind: input, shape index: {}]   ;;  %s2176_s4 = inlined_call_operand.vmem [shape: f32[1,16], index: 4, kind: input, shape index: {}]   ;;  %s2177_s5 = inlined_call_operand.vmem [shape: f32[32,16], index: 5, kind: output, shape index: {}]  }
   0x1 LB: > { %s1439_s19 = sadd.s32 4294967295, %s1910_s18   ;;  %p1443_p0 = scmp.ge.s32.totalorder %s1910_s18, 1  ;;  %s1910_s18 = sphi %s1942_s18, %s15_s18  }
   0x2   : > { %p188_p1 = scmp.lt.s32.totalorder %s1910_s18, 3 }
   0x4   : > { %p189_p2 = pnand %p1443_p0, %p188_p1 }
   0x5   : > { %v230_v0 = vld [vmem:[%s2173_s1] sm:$0xff] (!%p189_p2)  ;;  %v231_v1 = vld [vmem:[%s2173_s1 + $0x8] sm:$0xff] (!%p189_p2)  ;;  %v232_v2 = vld [vmem:[%s2173_s1 + $0x10] sm:$0xff] (!%p189_p2)  ;;  %s1444_s26 = sshll.u32 (!%p189_p2), %s1439_s19, 1  ;;  %vm241_vm0 = vcmask (!%p189_p2), 261120   ;;  %vm793_vm1 = vcmask (!%p189_p2), 523264  }
   0x6   : > { %192 = sbr.rel (%p189_p2) target bundleno = 570 (0x23a), region = 40  ;;  %v249_v3 = vand.u32 (!%p189_p2), 4294901760, %v230_v0  ;;  %v252_v4 = vand.u32 (!%p189_p2), 4294901760, %v231_v1  ;;  %v233_v5 = vld [vmem:[%s2173_s1 + $0x18] sm:$0xff] (!%p189_p2)  ;;  %v255_v6 = vand.u32 (!%p189_p2), 4294901760, %v232_v2  ;;  %p217_p3 = scmp.lt.s32.totalorder (!%p189_p2), %s1444_s26, 3 }
   0x7   : > { %v1965_v7 = vld [vmem:[%s2175_s3] sm:$0xff] (!%p189_p2)  ;;  %v258_v8 = vand.u32 (!%p189_p2), 4294901760, %v233_v5  ;;  %v1981_v14 = vld [vmem:[%s2175_s3 + $0x8] sm:$0xff] (!%p189_p2)  ;;  %v2019_v31 = vld [vmem:[%s2175_s3 + $0x10] sm:$0xff] (!%p189_p2)  ;;  %vm1380_vm2 = vcmask (!%p189_p2), 130048  }
   0x8   : > { %v801_v9 = vand.u32 (!%p189_p2), 4294901760, %v1965_v7  ;;  %v1968_v10 = vpack.c.bf16 (!%p189_p2), %v252_v4, %v249_v3  ;;  %v1972_v11 = vsub.f32 (!%p189_p2), %v230_v0, %v249_v3  ;;  %v1974_v12 = vsub.f32 (!%p189_p2), %v231_v1, %v252_v4  ;;  %v2028_v36 = vld [vmem:[%s2175_s3 + $0x18] sm:$0xff] (!%p189_p2) }
   0x9   : > { %v1976_v13 = vsub.f32 (!%p189_p2), %v232_v2, %v255_v6  ;;  %v1983_v15 = vpack.c.bf16 (!%p189_p2), %v258_v8, %v255_v6  ;;  %v1985_v16 = vsub.f32 (!%p189_p2), %v233_v5, %v258_v8  ;;  %v804_v22 = vand.u32 (!%p189_p2), 4294901760, %v1981_v14 }
   0xa   : > { %v1990_v17 = vsub.f32 (!%p189_p2), %v1965_v7, %v801_v9  ;;  %1729 = vmatprep.subr.bf16.mxu0 (!%p189_p2), %v1968_v10  ;;  %v340_v18 = vand.u32 (!%p189_p2), 4294901760, %v1972_v11  ;;  %v347_v19 = vand.u32 (!%p189_p2), 4294901760, %v1974_v12  ;;  %v807_v43 = vand.u32 (!%p189_p2), 4294901760, %v2019_v31  ;;  %v782_v7 = vld [vmem:[%s2175_s3 + $0x20] sm:$0xff] (!%p189_p2) }
   0xb   : > { %v354_v20 = vand.u32 (!%p189_p2), 4294901760, %v1976_v13  ;;  %1731 = vmatpush3.bf16.msra.mxu0 (!%p189_p2), %v1968_v10  ;;  %v361_v21 = vand.u32 (!%p189_p2), 4294901760, %v1985_v16  ;;  %v2040_v39 = vsub.f32 (!%p189_p2), %v1981_v14, %v804_v22  ;;  %v810_v45 = vand.u32 (!%p189_p2), 4294901760, %v2028_v36 }
   0xc   : > { %v896_v23 = vand.u32 (!%p189_p2), 4294901760, %v1990_v17  ;;  %1733 = vmatprep.subr.bf16.mxu0 (!%p189_p2), %v1983_v15  ;;  %v341_v26 = vsub.f32 (!%p189_p2), %v1972_v11, %v340_v18  ;;  %v348_v27 = vsub.f32 (!%p189_p2), %v1974_v12, %v347_v19  ;;  %v2050_v49 = vsub.f32 (!%p189_p2), %v2019_v31, %v807_v43 }
   0xd   : > { %s2179_s26 = smov (!%p217_p3, %s1444_s26), 3  ;;  %v355_v30 = vsub.f32 %v1976_v13, %v354_v20  ;;  %v362_v37 = vsub.f32 %v1985_v16, %v361_v21  ;;  %v903_v44 = vand.u32 4294901760, %v2040_v39  ;;  %v2058_v53 = vsub.f32 %v2028_v36, %v810_v45 }
   0xe   : > { %s1445_s8 = sshll.u32 %s2179_s26, 3  ;;  %v342_v34 = vand.u32 4294901760, %v341_v26  ;;  %v349_v35 = vand.u32 4294901760, %v348_v27  ;;  %v897_v38 = vsub.f32 %v1990_v17, %v896_v23  ;;  %v910_v56 = vand.u32 4294901760, %v2050_v49 }
   0xf   : > { %s220_s11 = scalar_lea.vmem %s2172_s0, %s1445_s8  ;;  %1735 = vmatpush3.bf16.msra.mxu0 %v1983_v15  ;;  %v356_v48 = vand.u32 4294901760, %v355_v30  ;;  %v363_v50 = vand.u32 4294901760, %v362_v37  ;;  %v904_v52 = vsub.f32 %v2040_v39, %v903_v44  ;;  %v917_v58 = vand.u32 4294901760, %v2058_v53  ;;  %s226_s7 = scalar_lea.vmem %s2177_s5, %s1445_s8 }
  0x10   : > { %v228_v24 = vld [vmem:[%s220_s11] sm:$0xff]  ;;  %v229_v25 = vld [vmem:[%s220_s11 + $0x8] sm:$0xff]  ;;  %v1736_v41 = vpack.c.bf16 %v349_v35, %v342_v34  ;;  %v898_v51 = vand.u32 4294901760, %v897_v38  ;;  %v911_v61 = vsub.f32 %v2050_v49, %v910_v56  ;;  %v1744_v3 = vpack.c.bf16 %v1974_v12, %v1972_v11 }
  0x11   : > { %v243_v28 = vsel %vm241_vm0, %v228_v24, 0  ;;  %v246_v29 = vsel %vm241_vm0, %v229_v25, 0  ;;  %v905_v57 = vand.u32 4294901760, %v904_v52  ;;  %v1740_v62 = vpack.c.bf16 %v363_v50, %v356_v48 }
  0x12   : > { %v2021_v32 = vand.u32 4294901760, %v243_v28  ;;  %v2023_v33 = vand.u32 4294901760, %v246_v29  ;;  %1737 = vmatprep.subr.bf16.mxu0 %v1736_v41  ;;  %v918_v0 = vsub.f32 %v2058_v53, %v917_v58  ;;  %v912_v1 = vand.u32 4294901760, %v911_v61 }
  0x13   : > { %v1792_v63 = vpack.c.bf16 %v905_v57, %v898_v51  ;;  %v1748_v5 = vpack.c.bf16 %v1985_v16, %v1976_v13  ;;  %v1760_v6 = vpack.c.bf16 %v347_v19, %v340_v18  ;;  %v1764_v8 = vpack.c.bf16 %v361_v21, %v354_v20  ;;  %v784_v16 = vld [vmem:[%s2175_s3 + $0x30] sm:$0xff]  ;;  %v785_v18 = vld [vmem:[%s2175_s3 + $0x38] sm:$0xff] }
  0x14   : > { %v318_v40 = vsub.f32 %v243_v28, %v2021_v32  ;;  %v328_v42 = vsub.f32 %v246_v29, %v2023_v33  ;;  %v919_v2 = vand.u32 4294901760, %v918_v0  ;;  %v2096_v11 = vpack.c.bf16 %v804_v22, %v801_v9  ;;  %v783_v9 = vld [vmem:[%s2175_s3 + $0x28] sm:$0xff] }
  0x15   : > { %1793 = vmatprep.subr.bf16.mxu1 %v1792_v63  ;;  %v2103_v12 = vpack.c.bf16 %v810_v45, %v807_v43  ;;  %v816_v13 = vand.u32 4294901760, %v783_v9  ;;  %v819_v21 = vand.u32 4294901760, %v784_v16  ;;  %v822_v22 = vand.u32 4294901760, %v785_v18 }
  0x16   : > { %v319_v46 = vand.u32 4294901760, %v318_v40  ;;  %v329_v47 = vand.u32 4294901760, %v328_v42  ;;  %1795 = vmatpush3.bf16.msra.mxu1 %v1792_v63  ;;  %v1796_v4 = vpack.c.bf16 %v919_v2, %v912_v1  ;;  %v1808_v38 = vpack.c.bf16 %v2040_v39, %v1990_v17  ;;  %v1449_v39 = vld [vmem:[%s2176_s4] ss:$0 sm:$0xff] }
  0x17   : > { %v937_v26 = vsub.f32 %v784_v16, %v819_v21  ;;  %v944_v27 = vsub.f32 %v785_v18, %v822_v22  ;;  %v1812_v63 = vpack.c.bf16 %v2058_v53, %v2050_v49 }
  0x18   : > { %v320_v54 = vsub.f32 %v318_v40, %v319_v46  ;;  %v330_v55 = vsub.f32 %v328_v42, %v329_v47  ;;  %1797 = vmatprep.subr.bf16.mxu1 %v1796_v4 }
  0x19   : > { %v938_v30 = vand.u32 4294901760, %v937_v26  ;;  %v945_v31 = vand.u32 4294901760, %v944_v27  ;;  %v1820_v43 = vpack.c.bf16 %v944_v27, %v937_v26 }
  0x1a   : > { %v321_v59 = vand.u32 4294901760, %v320_v54  ;;  %v331_v60 = vand.u32 4294901760, %v330_v55  ;;  %1799 = vmatpush3.bf16.msra.mxu1 %v1796_v4 }
  0x1b   : > { %v946_v34 = vsub.f32 %v944_v27, %v945_v31 }
  0x1c   : > { %1556 = vmatprep.mubr.f32.mxu0 %v321_v59 }
  0x1d   : > { %1557 = vmatmul.mubr.f32.vlgmr.msra.gmra.mrb[0].mxu0 %v331_v60  ;;  %v947_v36 = vand.u32 4294901760, %v946_v34 }
  0x1e   : > { %1739 = vmatpush3.bf16.msra.mxu0 %v1736_v41  ;;  %1567 = vmatprep.mubr.f32.mxu0 %v2021_v32  ;;  %v2126_v41 = vpack.c.bf16 %v822_v22, %v819_v21 }
  0x1f   : > { %1741 = vmatprep.subr.bf16.mxu0 %v1740_v62 }
  0x22   : > { %1743 = vmatpush3.bf16.msra.mxu0 %v1740_v62 }
  0x23   : > { %1745 = vmatprep.subr.bf16.mxu0 %v1744_v3 }
  0x25   : > { %1568 = vmatmul.mubr.f32.vlgmr.msra.gmra.mrb[0].mxu0 %v2023_v33 }
  0x26   : > { %1747 = vmatpush3.bf16.msra.mxu0 %v1744_v3  ;;  %1578 = vmatprep.mubr.f32.mxu0 %v318_v40 }
  0x27   : > { %1749 = vmatprep.subr.bf16.mxu0 %v1748_v5 }
  0x2a   : > { %1751 = vmatpush3.bf16.msra.mxu0 %v1748_v5 }
  0x2b   : > { %1753 = vmatprep.subr.bf16.mxu0 %v1968_v10 }
  0x2d   : > { %1579 = vmatmul.mubr.f32.vlgmr.msra.gmra.mrb[0].mxu0 %v328_v42 }
  0x2e   : > { %1755 = vmatpush3.bf16.msra.mxu0 %v1968_v10  ;;  %1589 = vmatprep.mubr.f32.mxu0 %v319_v46  ;;  %v1852_v46 = vpack.c.bf16 %v945_v31, %v938_v30 }
  0x2f   : > { %1757 = vmatprep.subr.bf16.mxu0 %v1983_v15 }
  0x32   : > { %1759 = vmatpush3.bf16.msra.mxu0 %v1983_v15 }
  0x33   : > { %1761 = vmatprep.subr.bf16.mxu0 %v1760_v6 }
  0x35   : > { %1590 = vmatmul.mubr.f32.vlgmr.msra.gmra.mrb[0].mxu0 %v329_v47  ;;  %v1448_v47 = vld [vmem:[%s2174_s2] ss:$0 sm:$0xff] }
  0x36   : > { %1763 = vmatpush3.bf16.msra.mxu0 %v1760_v6  ;;  %1600 = vmatprep.mubr.f32.mxu0 %v2021_v32 }
  0x37   : > { %1765 = vmatprep.subr.bf16.mxu0 %v1764_v8 }
  0x3a   : > { %1767 = vmatpush3.bf16.msra.mxu0 %v1764_v8  ;;  %v1840_v8 = vpack.c.bf16 %v903_v44, %v896_v23 }
  0x3b   : > { %1769 = vmatprep.subr.bf16.mxu0 %v1968_v10 }
  0x3d   : > { %1601 = vmatmul.mubr.f32.vlgmr.msra.gmra.mrb[0].mxu0 %v2023_v33 }
  0x3e   : > { %1771 = vmatpush3.bf16.msra.mxu0 %v1968_v10  ;;  %1611 = vmatprep.mubr.f32.mxu0 %v2021_v32  ;;  %v813_v10 = vand.u32 4294901760, %v782_v7 }
  0x3f   : > { %1773 = vmatprep.subr.bf16.mxu0 %v1983_v15 }
  0x40   : > { %v923_v14 = vsub.f32 %v782_v7, %v813_v10  ;;  %v2124_v40 = vpack.c.bf16 %v816_v13, %v813_v10  ;;  %v1844_v7 = vpack.c.bf16 %v917_v58, %v910_v56 }
  0x42   : > { %1775 = vmatpush3.bf16.msra.mxu0 %v1983_v15  ;;  %v930_v15 = vsub.f32 %v783_v9, %v816_v13  ;;  %v924_v19 = vand.u32 4294901760, %v923_v14 }
  0x43   : > { %1777 = vmatprep.subr.bf16.mxu0 %v2096_v11 }
  0x44   : > { %v931_v20 = vand.u32 4294901760, %v930_v15  ;;  %v925_v24 = vsub.f32 %v923_v14, %v924_v19  ;;  %v1816_v42 = vpack.c.bf16 %v930_v15, %v923_v14 }
  0x45   : > { %1612 = vmatmul.mubr.f32.vlgmr.msra.gmra.mrb[0].mxu0 %v2023_v33  ;;  %v939_v33 = vsub.f32 %v937_v26, %v938_v30 }
  0x46   : > { %1779 = vmatpush3.bf16.msra.mxu0 %v2096_v11  ;;  %v932_v25 = vsub.f32 %v930_v15, %v931_v20  ;;  %v926_v28 = vand.u32 4294901760, %v925_v24  ;;  %v1848_v45 = vpack.c.bf16 %v931_v20, %v924_v19 }
  0x47   : > { %1781 = vmatprep.subr.bf16.mxu0 %v2103_v12  ;;  %v940_v35 = vand.u32 4294901760, %v939_v33 }
  0x48   : > { %v933_v29 = vand.u32 4294901760, %v932_v25 }
  0x49   : > { %v1804_v37 = vpack.c.bf16 %v947_v36, %v940_v35 }
  0x4a   : > { %1783 = vmatpush3.bf16.msra.mxu0 %v2103_v12  ;;  %v1800_v32 = vpack.c.bf16 %v933_v29, %v926_v28 }
  0x4b   : > { %1785 = vmatprep.subr.bf16.mxu0 %v2124_v40 }
  0x4c   : > { %1801 = vmatprep.subr.bf16.mxu1 %v1800_v32 }
  0x4d   : > { %1803 = vmatpush3.bf16.msra.mxu1 %v1800_v32 }
  0x4e   : > { %1805 = vmatprep.subr.bf16.mxu1 %v1804_v37  ;;  %1787 = vmatpush3.bf16.msra.mxu0 %v2124_v40 }
  0x4f   : > { %1789 = vmatprep.subr.bf16.mxu0 %v2126_v41 }
  0x51   : > { %1807 = vmatpush3.bf16.msra.mxu1 %v1804_v37 }
  0x52   : > { %1809 = vmatprep.subr.bf16.mxu1 %v1808_v38  ;;  %1791 = vmatpush3.bf16.msra.mxu0 %v2126_v41 }
 0x118   : > { %v1613_v48 = vpop.f32.mrb[0].mxu0 }
 0x119   : > { %v1872_v50 = vadd.f32 %v1613_v48, %v1448_v47  ;;  %v766_v51 = vpop.f32.mrb[1].mxu0 }
 0x11a   : > { %v1873_v52 = vadd.f32 %v1448_v47, %v766_v51 }
 0x11b   : > { %v777_v54 = vmax.f32 %v1872_v50, 0.0 }
 0x11c   : > { %v776_v55 = vmax.f32 %v1873_v52, 0.0 }
 0x11d   : > { %v798_v57 = vsel %vm793_vm1, %v777_v54, 0 }
 0x11e   : > { %v883_v59 = vand.u32 4294901760, %v798_v57  ;;  %v795_v60 = vsel %vm793_vm1, %v776_v55, 0 }
 0x11f   : > { %v873_v61 = vand.u32 4294901760, %v795_v60 }
 0x120   : > { %v884_v62 = vsub.f32 %v798_v57, %v883_v59 }
 0x121   : > { %1649 = vmatprep.mubr.f32.mxu1 %v873_v61  ;;  %v874_v0 = vsub.f32 %v795_v60, %v873_v61 }
 0x122   : > { %v885_v1 = vand.u32 4294901760, %v884_v62  ;;  %1650 = vmatmul.mubr.f32.vlgmr.msra.gmra.mrb[0].mxu1 %v883_v59 }
 0x123   : > { %1811 = vmatpush3.bf16.msra.mxu1 %v1808_v38  ;;  %1668 = vmatprep.mubr.f32.mxu1 %v874_v0  ;;  %v875_v2 = vand.u32 4294901760, %v874_v0 }
 0x124   : > { %1813 = vmatprep.subr.bf16.mxu1 %v1812_v63  ;;  %v886_v3 = vsub.f32 %v884_v62, %v885_v1 }
 0x125   : > { %v876_v4 = vsub.f32 %v874_v0, %v875_v2 }
 0x126   : > { %v887_v6 = vand.u32 4294901760, %v886_v3 }
 0x127   : > { %1815 = vmatpush3.bf16.msra.mxu1 %v1812_v63  ;;  %v877_v5 = vand.u32 4294901760, %v876_v4 }
 0x128   : > { %1817 = vmatprep.subr.bf16.mxu1 %v1816_v42 }
 0x129   : > { %1630 = vmatprep.mubr.f32.mxu0 %v877_v5 }
 0x12a   : > { %1631 = vmatmul.mubr.f32.vlgmr.msra.gmra.mrb[2].mxu0 %v887_v6 }
 0x12b   : > { %1819 = vmatpush3.bf16.msra.mxu1 %v1816_v42 }
 0x12c   : > { %1821 = vmatprep.subr.bf16.mxu1 %v1820_v43 }
 0x12f   : > { %1823 = vmatpush3.bf16.msra.mxu1 %v1820_v43 }
 0x130   : > { %1825 = vmatprep.subr.bf16.mxu1 %v2096_v11 }
 0x132   : > { %1669 = vmatmul.mubr.f32.vlgmr.msra.gmra.mrb[0].mxu1 %v884_v62 }
 0x133   : > { %1827 = vmatpush3.bf16.msra.mxu1 %v2096_v11  ;;  %1687 = vmatprep.mubr.f32.mxu1 %v875_v2 }
 0x134   : > { %1829 = vmatprep.subr.bf16.mxu1 %v2103_v12 }
 0x137   : > { %1831 = vmatpush3.bf16.msra.mxu1 %v2103_v12 }
 0x138   : > { %1833 = vmatprep.subr.bf16.mxu1 %v2124_v40 }
 0x13b   : > { %1835 = vmatpush3.bf16.msra.mxu1 %v2124_v40 }
 0x13c   : > { %1837 = vmatprep.subr.bf16.mxu1 %v2126_v41 }
 0x13f   : > { %1839 = vmatpush3.bf16.msra.mxu1 %v2126_v41 }
 0x140   : > { %1841 = vmatprep.subr.bf16.mxu1 %v1840_v8 }
 0x142   : > { %1688 = vmatmul.mubr.f32.vlgmr.msra.gmra.mrb[0].mxu1 %v885_v1 }
 0x143   : > { %1843 = vmatpush3.bf16.msra.mxu1 %v1840_v8  ;;  %1706 = vmatprep.mubr.f32.mxu1 %v873_v61 }
 0x144   : > { %1845 = vmatprep.subr.bf16.mxu1 %v1844_v7 }
 0x147   : > { %1847 = vmatpush3.bf16.msra.mxu1 %v1844_v7 }
 0x148   : > { %1849 = vmatprep.subr.bf16.mxu1 %v1848_v45 }
 0x14b   : > { %1851 = vmatpush3.bf16.msra.mxu1 %v1848_v45 }
 0x14c   : > { %1853 = vmatprep.subr.bf16.mxu1 %v1852_v46 }
 0x14f   : > { %1855 = vmatpush3.bf16.msra.mxu1 %v1852_v46 }
 0x150   : > { %1857 = vmatprep.subr.bf16.mxu1 %v2096_v11 }
 0x152   : > { %1707 = vmatmul.mubr.f32.vlgmr.msra.gmra.mrb[0].mxu1 %v883_v59 }
 0x153   : > { %1859 = vmatpush3.bf16.msra.mxu1 %v2096_v11  ;;  %1725 = vmatprep.mubr.f32.mxu1 %v873_v61 }
 0x154   : > { %1861 = vmatprep.subr.bf16.mxu1 %v2103_v12 }
 0x157   : > { %1863 = vmatpush3.bf16.msra.mxu1 %v2103_v12 }
 0x158   : > { %1865 = vmatprep.subr.bf16.mxu1 %v2124_v40 }
 0x15b   : > { %1867 = vmatpush3.bf16.msra.mxu1 %v2124_v40 }
 0x15c   : > { %1869 = vmatprep.subr.bf16.mxu1 %v2126_v41 }
 0x15f   : > { %1871 = vmatpush3.bf16.msra.mxu1 %v2126_v41 }
 0x162   : > { %1726 = vmatmul.mubr.f32.vlgmr.msra.gmra.mrb[0].mxu1 %v883_v59 }
 0x1fd   : > { %v1632_v17 = vpop.f32.mrb[2].mxu0 }
 0x1fe   : > { %v879_v23 = vpop.f32.mrb[3].mxu0  ;;  %v890_v44 = vadd.f32 %v1632_v17, %v1449_v39 }
 0x1ff   : > { %v880_v49 = vadd.f32 %v1449_v39, %v879_v23 }
 0x235   : > { %v1727_v53 = vpop.f32.mrb[0].mxu1 }
 0x236   : > { %v1875_v56 = vadd.f32 %v1727_v53, %v890_v44  ;;  %v1370_v58 = vpop.f32.mrb[1].mxu1 }
 0x237   : > { %v1877_v11 = vadd.f32 %v1370_v58, %v880_v49 }
 0x238   : > { %1382 = vst.msk [vmem:[%s226_s7 + $0x8] sm:$0xff] %vm1380_vm2, %v1875_v56 }
 0x239   : > { %1381 = vst.msk [vmem:[%s226_s7] sm:$0xff] %vm1380_vm2, %v1877_v11 }
 0x23a PF: > { %s15_s18 = sadd.s32 1, %s1910_s18  }
 0x23b   : > { %p12_p4 = scmp.ge.s32.totalorder %s15_s18, 4  }
 0x23d   :  { %14 = sbr.rel (!%p12_p4) target bundleno = 1 (0x1), region = 70 }

</bundles_post_ra>
